<compile_context>
chip_gen: v7x
topology: tpu7x:2x2x1
jax: 0.10.0
libtpu: 0.0.40
codegen_flags: <defaults>
</compile_context>

<pallas_src>
import functools

import jax
import jax.numpy as jnp
from jax import lax
from jax.experimental import pallas as pl
from jax.experimental.pallas import tpu as pltpu

_LANE = 128
_SUBLANE = 8
# (8192, 128) f32 tile = 4 MiB; 3 inputs x 2 pipeline buffers = 24 MiB VMEM.
# Fits comfortably under the explicit 48 MiB scoped-VMEM limit below on
# v5e/v6e (128 MiB physical) and v7x (64 MiB physical per TC).
_MAX_TILE_ROWS = 8192


def _wmse_sum_kernel(in_ref, tgt_ref, w_ref, out_ref, *, tile_rows,
                     valid_rows, needs_mask):
    """Accumulate sum(weights * (input - target)^2) into an (8,128) slab."""
    k = pl.program_id(0)

    @pl.when(k == 0)
    def _():
        out_ref[...] = jnp.zeros_like(out_ref)

    d = in_ref[...].astype(jnp.float32) - tgt_ref[...].astype(jnp.float32)
    contrib = w_ref[...].astype(jnp.float32) * d * d

    if needs_mask:
        # Only the last grid step can run past the end of the array; rows at or
        # beyond `valid_rows` hold unspecified data and must not contribute.
        # (The <=1023-element zero-padded tail *inside* the array is harmless
        # because its weights are zero.)  Mask is applied to the contribution.
        row_ids = k * tile_rows + lax.broadcasted_iota(
            jnp.int32, (tile_rows, _LANE), 0)
        contrib = jnp.where(row_ids < valid_rows, contrib, 0.0)

    # (tile_rows, 128) -> (tile_rows//8, 8, 128): summing the leading axis is
    # sublane-aligned elementwise VPU work.  The single cross-lane reduce over
    # the final (8, 128) slab is done in the wrapper.
    out_ref[...] += jnp.sum(
        contrib.reshape(tile_rows // _SUBLANE, _SUBLANE, _LANE), axis=0)


@jax.jit
def wmse_loss(x, target, weights):
    """JAX/Pallas equivalent of WMSELoss.forward(input, target, weights)."""
    assert x.shape == target.shape, "input and target must have the same shape"
    if weights.shape != x.shape:
        # TODO(synk): for small broadcastable weights (per-channel / scalar),
        # pass them unexpanded and broadcast inside the kernel instead of
        # materializing n elements here.  No-op when shapes already match.
        weights = jnp.broadcast_to(weights, x.shape)

    n = x.size  # static at trace time
    xf = x.reshape(-1)
    tf = target.reshape(-1)
    wf = weights.reshape(-1)

    # Pad only up to one (8, 128) vreg tile (<= 1023 elements).  Padded
    # weights are zero => zero contribution.  For n % 1024 == 0 this branch is
    # skipped entirely and no HBM copies are made.
    pad = (-n) % (_SUBLANE * _LANE)
    if pad:
        xf = jnp.pad(xf, (0, pad))
        tf = jnp.pad(tf, (0, pad))
        wf = jnp.pad(wf, (0, pad))

    rows = (n + pad) // _LANE            # always a multiple of 8
    tile_rows = min(_MAX_TILE_ROWS, rows)  # multiple of 8
    steps = pl.cdiv(rows, tile_rows)
    needs_mask = (rows % tile_rows) != 0   # ragged last block -> in-kernel mask

    x2 = xf.reshape(rows, _LANE)
    t2 = tf.reshape(rows, _LANE)
    w2 = wf.reshape(rows, _LANE)

    kernel = functools.partial(
        _wmse_sum_kernel,
        tile_rows=tile_rows,
        valid_rows=rows,
        needs_mask=needs_mask,
    )

    in_spec = pl.BlockSpec((tile_rows, _LANE), lambda k: (k, 0))

    partial_slab = pl.pallas_call(
        kernel,
        out_shape=jax.ShapeDtypeStruct((_SUBLANE, _LANE), jnp.float32),
        grid_spec=pltpu.PrefetchScalarGridSpec(
            num_scalar_prefetch=0,
            grid=(steps,),
            in_specs=[in_spec, in_spec, in_spec],
            out_specs=pl.BlockSpec((_SUBLANE, _LANE), lambda k: (0, 0)),
        ),
        compiler_params=pltpu.CompilerParams(
            dimension_semantics=("arbitrary",),
            vmem_limit_bytes=48 * 1024 * 1024,
        ),
    )(x2, t2, w2)

    # Final tiny reduce (1024 elements) and mean divisor in the wrapper.
    return jnp.sum(partial_slab) / jnp.float32(n)


if __name__ == "__main__":
    key = jax.random.PRNGKey(0)
    shape = (2, 4, 16, 16)  # NCHW, as in PyTorch
    k1, k2, k3 = jax.random.split(key, 3)
    x = jax.random.normal(k1, shape, dtype=jnp.float32)
    target = jax.random.normal(k2, shape, dtype=jnp.float32)
    weights = jax.random.uniform(k3, shape, dtype=jnp.float32)

    loss = jax.block_until_ready(wmse_loss(x, target, weights))

    # Pure-JAX reference cross-check (same semantics as the PyTorch forward).
    ref = jnp.mean(weights * (x - target) ** 2)
    assert jnp.allclose(loss, ref, rtol=1e-5, atol=1e-6), (loss, ref)

    print("KERNEL_OK")
</pallas_src>

<mosaic_0001>
module attributes {stable_mosaic.version = 11 : i64} {
  func.func @_wmse_sum_kernel(%arg0: i32, %arg1: memref<16x128xf32, #tpu.memory_space<vmem>>, %arg2: memref<16x128xf32, #tpu.memory_space<vmem>>, %arg3: memref<16x128xf32, #tpu.memory_space<vmem>>, %arg4: memref<8x128xf32, #tpu.memory_space<vmem>>) attributes {dimension_semantics = [#tpu.dimension_semantics<arbitrary>], iteration_bounds = array<i64: 1>, scalar_prefetch = 0 : i64, scratch_operands = 0 : i64, tpu.core_type = #tpu.core_type<tc>, window_params = [{transform_indices = @transform_0, window_bounds = array<i64: 16, 128>}, {transform_indices = @transform_1, window_bounds = array<i64: 16, 128>}, {transform_indices = @transform_2, window_bounds = array<i64: 16, 128>}, {pipeline_mode = #tpu.pipeline_mode<synchronous>, transform_indices = @transform_3, window_bounds = array<i64: 8, 128>}]} {
    %c0_i32 = arith.constant 0 : i32
    %0 = arith.cmpi eq, %arg0, %c0_i32 : i32
    %1 = arith.extui %0 : i1 to i32
    %c0_i32_0 = arith.constant 0 : i32
    %2 = arith.cmpi ne, %1, %c0_i32_0 : i32
    scf.if %2 {
      %cst_10 = arith.constant 0.000000e+00 : f32
      %14 = vector.broadcast %cst_10 : f32 to vector<8x128xf32>
      %c0_11 = arith.constant 0 : index
      %c0_12 = arith.constant 0 : index
      %15 = vector.load %arg4[%c0_11, %c0_12] : memref<8x128xf32, #tpu.memory_space<vmem>>, vector<8x128xf32>
      tpu.vector_store %arg4[%c0_11, %c0_12], %14 {strides = array<i32>} : memref<8x128xf32, #tpu.memory_space<vmem>>, vector<8x128xf32>,
    } else {
    }
    %c0 = arith.constant 0 : index
    %c0_1 = arith.constant 0 : index
    %3 = vector.load %arg1[%c0, %c0_1] : memref<16x128xf32, #tpu.memory_space<vmem>>, vector<16x128xf32>
    %c0_2 = arith.constant 0 : index
    %c0_3 = arith.constant 0 : index
    %4 = vector.load %arg2[%c0_2, %c0_3] : memref<16x128xf32, #tpu.memory_space<vmem>>, vector<16x128xf32>
    %5 = arith.subf %3, %4 : vector<16x128xf32>
    %c0_4 = arith.constant 0 : index
    %c0_5 = arith.constant 0 : index
    %6 = vector.load %arg3[%c0_4, %c0_5] : memref<16x128xf32, #tpu.memory_space<vmem>>, vector<16x128xf32>
    %7 = arith.mulf %6, %5 : vector<16x128xf32>
    %8 = arith.mulf %7, %5 : vector<16x128xf32>
    %c0_6 = arith.constant 0 : index
    %c0_7 = arith.constant 0 : index
    %9 = vector.load %arg4[%c0_6, %c0_7] : memref<8x128xf32, #tpu.memory_space<vmem>>, vector<8x128xf32>
    %10 = vector.shape_cast %8 : vector<16x128xf32> to vector<2x8x128xf32>
    %cst = arith.constant dense<0.000000e+00> : vector<8x128xf32>
    %11 = vector.multi_reduction <add>, %10, %cst [0] : vector<2x8x128xf32> to vector<8x128xf32>
    %12 = arith.addf %9, %11 : vector<8x128xf32>
    %c0_8 = arith.constant 0 : index
    %c0_9 = arith.constant 0 : index
    %13 = vector.load %arg4[%c0_8, %c0_9] : memref<8x128xf32, #tpu.memory_space<vmem>>, vector<8x128xf32>
    tpu.vector_store %arg4[%c0_8, %c0_9], %12 {strides = array<i32>} : memref<8x128xf32, #tpu.memory_space<vmem>>, vector<8x128xf32>,
    return
  }
  func.func @transform_0(%arg0: i32) -> (i32, i32) {
    %c0_i32 = arith.constant 0 : i32
    %c0_i32_0 = arith.constant 0 : i32
    return %arg0, %c0_i32 : i32, i32
  }
  func.func @transform_1(%arg0: i32) -> (i32, i32) {
    %c0_i32 = arith.constant 0 : i32
    %c0_i32_0 = arith.constant 0 : i32
    return %arg0, %c0_i32 : i32, i32
  }
  func.func @transform_2(%arg0: i32) -> (i32, i32) {
    %c0_i32 = arith.constant 0 : i32
    %c0_i32_0 = arith.constant 0 : i32
    return %arg0, %c0_i32 : i32, i32
  }
  func.func @transform_3(%arg0: i32) -> (i32, i32) {
    %c0_i32 = arith.constant 0 : i32
    %c0_i32_0 = arith.constant 0 : i32
    %c0_i32_1 = arith.constant 0 : i32
    return %c0_i32, %c0_i32_0 : i32, i32
  }
}

</mosaic_0001>

<bundles_post_ra>
// kernel: wmse_loss.1
= control target key start
LH: loop header
LB: loop body
LE: loop exit
PB: predicated region body
PF: predicated region fallthrough
CT: control target
= control target key end

     0   :  { %s81_s0 = inlined_call_operand.vmem [shape: f32[16,128], index: 0, kind: input, shape index: {}]   ;;  %s82_s1 = inlined_call_operand.vmem [shape: f32[16,128], index: 1, kind: input, shape index: {}]   ;;  %s83_s2 = inlined_call_operand.vmem [shape: f32[16,128], index: 2, kind: input, shape index: {}]   ;;  %s84_s3 = inlined_call_operand.vmem [shape: f32[8,128], index: 3, kind: output, shape index: {}]  }
   0x1   :  { %v19_v0 = vld [vmem:[%s81_s0] sm:$0xff]  ;;  %v20_v1 = vld [vmem:[%s81_s0 + $0x8] sm:$0xff] }
   0x2   :  { %v21_v2 = vld [vmem:[%s82_s1] sm:$0xff]  ;;  %v22_v3 = vld [vmem:[%s82_s1 + $0x8] sm:$0xff] }
   0x3   :  { %v23_v4 = vsub.f32 %v19_v0, %v21_v2  ;;  %v25_v5 = vld [vmem:[%s83_s2] sm:$0xff]  ;;  %v26_v6 = vld [vmem:[%s83_s2 + $0x8] sm:$0xff]  ;;  %v24_v7 = vsub.f32 %v20_v1, %v22_v3 }
   0x5   :  { %v27_v8 = vmul.f32 %v25_v5, %v23_v4  ;;  %v28_v9 = vmul.f32 %v26_v6, %v24_v7 }
   0x7   :  { %v29_v10 = vmul.f32 %v27_v8, %v23_v4  ;;  %v30_v11 = vmul.f32 %v28_v9, %v24_v7 }
   0x9   :  { %v32_v12 = vadd.f32 %v30_v11, %v29_v10 }
   0xb   :  { %34 = vst [vmem:[%s84_s3] sm:$0xff] %v32_v12 }

</bundles_post_ra>
